<compile_context>
chip_gen: v7x
topology: tpu7x:2x2x1
jax: 0.10.0
libtpu: 0.0.40
codegen_flags: <defaults>
</compile_context>

<pallas_src>
import jax
import jax.numpy as jnp
from jax.experimental import pallas as pl
from jax.experimental.pallas import tpu as pltpu


def _round_up(n, m):
    return ((n + m - 1) // m) * m


def _device_kind():
    try:
        return jax.devices()[0].device_kind.lower()
    except Exception:
        return ""


def _default_tb(kind):
    # ~2 KiB of double-buffered VMEM per row (x and out both lane-pad to 128).
    if "v7" in kind or "v6" in kind:
        return 16384     # ~32 MiB of pipeline buffers
    return 8192          # v5e / unknown: ~16 MiB


def _f5_kernel(x_ref, w_ref, b_ref, o_ref):
    # x_ref: (TB, 84)   w_ref: (84, 10)   b_ref: (1, 10)   o_ref: (TB, 10)
    # Linear: y = x @ W^T + b  (W pre-transposed to (in, out)); accumulate f32.
    y = jnp.dot(x_ref[...], w_ref[...], preferred_element_type=jnp.float32)
    y = y + b_ref[...]

    # Numerically stable LogSoftmax over the last dim.
    m = jnp.max(y, axis=-1, keepdims=True)
    s = y - m
    lse = jnp.log(jnp.sum(jnp.exp(s), axis=-1, keepdims=True))
    o_ref[...] = (s - lse).astype(o_ref.dtype)


def f5_forward(x, weight, bias, *, tb=None):
    """x: (B, 84) float32/bf16; weight: (10, 84) f32; bias: (10,) f32.

    Returns (B, 10) float32 log-probabilities.
    """
    B, D_in = x.shape
    D_out = weight.shape[0]

    kind = _device_kind()
    if tb is None:
        tb = _default_tb(kind)

    w_t = weight.T.astype(jnp.float32)                 # (84, 10), VMEM-resident
    b2 = bias.reshape(1, D_out).astype(jnp.float32)    # (1, 10),  VMEM-resident

    # Batch tile: multiple of 8 sublanes, clamped for small batches.  B itself
    # is NOT padded; the final ragged block is handled by Pallas store masking.
    tb = max(8, min(_round_up(tb, 8), _round_up(B, 8)))
    grid = (pl.cdiv(B, tb),)

    # v7x: actually split the batch axis across both TensorCores.
    batch_sem = pltpu.CORE_PARALLEL if "v7" in kind else pltpu.PARALLEL

    out = pl.pallas_call(
        _f5_kernel,
        out_shape=jax.ShapeDtypeStruct((B, D_out), jnp.float32),
        grid_spec=pl.GridSpec(
            grid=grid,
            in_specs=[
                pl.BlockSpec((tb, D_in), lambda i: (i, 0)),     # batch-tiled x
                pl.BlockSpec((D_in, D_out), lambda i: (0, 0)),  # resident W^T
                pl.BlockSpec((1, D_out), lambda i: (0, 0)),     # resident bias
            ],
            out_specs=pl.BlockSpec((tb, D_out), lambda i: (i, 0)),
        ),
        compiler_params=pltpu.CompilerParams(
            dimension_semantics=(batch_sem,),
            vmem_limit_bytes=40 << 20,   # room for double-buffered 8-16K tiles
        ),
    )(x, w_t, b2)

    return out


def _reference(x, weight, bias):
    y = x.astype(jnp.float32) @ weight.T + bias
    return jax.nn.log_softmax(y, axis=-1)


if __name__ == "__main__":
    key = jax.random.PRNGKey(0)
    k_x, k_w, k_b, k_x2 = jax.random.split(key, 4)

    B, D_in, D_out = 8, 84, 10

    # Deterministic parameter init (PyTorch Linear default: U(-1/sqrt(in), 1/sqrt(in)))
    bound = 1.0 / (D_in ** 0.5)
    weight = jax.random.uniform(k_w, (D_out, D_in), jnp.float32, -bound, bound)
    bias = jax.random.uniform(k_b, (D_out,), jnp.float32, -bound, bound)

    # Small primary test (B = 8, single tile).
    x = jax.random.normal(k_x, (B, D_in), jnp.float32)
    out = jax.block_until_ready(f5_forward(x, weight, bias))
    ref = _reference(x, weight, bias)
    assert out.shape == (B, D_out)
    assert jnp.allclose(out, ref, atol=1e-5, rtol=1e-5), "mismatch vs reference (B=8)"

    # Secondary test exercising the multi-step grid + ragged (masked) final block.
    B2 = 200
    x2 = jax.random.normal(k_x2, (B2, D_in), jnp.float32)
    out2 = jax.block_until_ready(f5_forward(x2, weight, bias, tb=64))
    ref2 = _reference(x2, weight, bias)
    assert out2.shape == (B2, D_out)
    assert jnp.allclose(out2, ref2, atol=1e-5, rtol=1e-5), "mismatch vs reference (B=200)"

    print("KERNEL_OK")
</pallas_src>

<mosaic_0001>
module attributes {stable_mosaic.version = 11 : i64} {
  func.func @_f5_kernel(%arg0: i32, %arg1: memref<8x84xf32, #tpu.memory_space<vmem>>, %arg2: memref<84x10xf32, #tpu.memory_space<vmem>>, %arg3: memref<1x10xf32, #tpu.memory_space<vmem>>, %arg4: memref<8x10xf32, #tpu.memory_space<vmem>>) attributes {dimension_semantics = [#tpu.dimension_semantics<parallel>], iteration_bounds = array<i64: 1>, scalar_prefetch = 0 : i64, scratch_operands = 0 : i64, tpu.core_type = #tpu.core_type<tc>, window_params = [{transform_indices = @transform_0, window_bounds = array<i64: 8, 84>}, {pipeline_mode = #tpu.pipeline_mode<synchronous>, transform_indices = @transform_1, window_bounds = array<i64: 84, 10>}, {pipeline_mode = #tpu.pipeline_mode<synchronous>, transform_indices = @transform_2, window_bounds = array<i64: 1, 10>}, {transform_indices = @transform_3, window_bounds = array<i64: 8, 10>}]} {
    %c0 = arith.constant 0 : index
    %c0_0 = arith.constant 0 : index
    %0 = vector.load %arg1[%c0, %c0_0] : memref<8x84xf32, #tpu.memory_space<vmem>>, vector<8x84xf32>
    %c0_1 = arith.constant 0 : index
    %c0_2 = arith.constant 0 : index
    %1 = vector.load %arg2[%c0_1, %c0_2] : memref<84x10xf32, #tpu.memory_space<vmem>>, vector<84x10xf32>
    %cst = arith.constant dense<0.000000e+00> : vector<8x10xf32>
    %2 = tpu.matmul %0, %1, %cst {dimension_numbers = #tpu.dot_dimension_numbers<[1], [0], [0], [1], [0, 0, 1, 1], [], []>} : vector<8x84xf32>, vector<84x10xf32>, vector<8x10xf32> -> vector<8x10xf32>
    %c0_3 = arith.constant 0 : index
    %c0_4 = arith.constant 0 : index
    %3 = vector.load %arg3[%c0_3, %c0_4] : memref<1x10xf32, #tpu.memory_space<vmem>>, vector<1x10xf32>
    %4 = vector.broadcast %3 : vector<1x10xf32> to vector<8x10xf32>
    %5 = arith.addf %2, %4 : vector<8x10xf32>
    %cst_5 = arith.constant dense<0xFF800000> : vector<8xf32>
    %6 = vector.multi_reduction <maximumf>, %5, %cst_5 [1] : vector<8x10xf32> to vector<8xf32>
    %7 = vector.shape_cast %6 : vector<8xf32> to vector<8x1xf32>
    %8 = vector.broadcast %7 : vector<8x1xf32> to vector<8x10xf32>
    %9 = arith.subf %5, %8 : vector<8x10xf32>
    %10 = math.exp %9 : vector<8x10xf32>
    %cst_6 = arith.constant dense<0.000000e+00> : vector<8xf32>
    %11 = vector.multi_reduction <add>, %10, %cst_6 [1] : vector<8x10xf32> to vector<8xf32>
    %12 = vector.shape_cast %11 : vector<8xf32> to vector<8x1xf32>
    %13 = math.log %12 : vector<8x1xf32>
    %14 = vector.broadcast %13 : vector<8x1xf32> to vector<8x10xf32>
    %15 = arith.subf %9, %14 : vector<8x10xf32>
    %c0_7 = arith.constant 0 : index
    %c0_8 = arith.constant 0 : index
    %16 = vector.load %arg4[%c0_7, %c0_8] : memref<8x10xf32, #tpu.memory_space<vmem>>, vector<8x10xf32>
    tpu.vector_store %arg4[%c0_7, %c0_8], %15 {strides = array<i32>} : memref<8x10xf32, #tpu.memory_space<vmem>>, vector<8x10xf32>,
    return
  }
  func.func @transform_0(%arg0: i32) -> (i32, i32) {
    %c0_i32 = arith.constant 0 : i32
    %c0_i32_0 = arith.constant 0 : i32
    return %arg0, %c0_i32 : i32, i32
  }
  func.func @transform_1(%arg0: i32) -> (i32, i32) {
    %c0_i32 = arith.constant 0 : i32
    %c0_i32_0 = arith.constant 0 : i32
    %c0_i32_1 = arith.constant 0 : i32
    return %c0_i32, %c0_i32_0 : i32, i32
  }
  func.func @transform_2(%arg0: i32) -> (i32, i32) {
    %c0_i32 = arith.constant 0 : i32
    %c0_i32_0 = arith.constant 0 : i32
    %c0_i32_1 = arith.constant 0 : i32
    return %c0_i32, %c0_i32_0 : i32, i32
  }
  func.func @transform_3(%arg0: i32) -> (i32, i32) {
    %c0_i32 = arith.constant 0 : i32
    %c0_i32_0 = arith.constant 0 : i32
    return %arg0, %c0_i32 : i32, i32
  }
}

</mosaic_0001>

<bundles_post_ra>
// kernel: tpu_custom_call.1
= control target key start
LH: loop header
LB: loop body
LE: loop exit
PB: predicated region body
PF: predicated region fallthrough
CT: control target
= control target key end

     0   :  { %v227_v3 = vmov 0.0|0.0   ;;  %vm228_vm0 = vmmov 0   ;;  %v229_v6 = vmov 0.0   ;;  %s305_s0 = inlined_call_operand.vmem [shape: f32[8,84], index: 0, kind: input, shape index: {}]   ;;  %s306_s1 = inlined_call_operand.vmem [shape: f32[84,10], index: 1, kind: input, shape index: {}]   ;;  %s307_s2 = inlined_call_operand.vmem [shape: f32[1,10], index: 2, kind: input, shape index: {}]   ;;  %s308_s3 = inlined_call_operand.hbm [shape: f32[8,10], index: 3, kind: output, shape index: {}]  }
   0x1   :  { %v16_v0 = vld [vmem:[%s306_s1] sm:$0xff]  ;;  %v17_v1 = vld [vmem:[%s306_s1 + $0x8] sm:$0xff]  ;;  %v18_v2 = vld [vmem:[%s306_s1 + $0x10] sm:$0xff]  ;;  %180 = vmatprep.subr.bf16.mxu0 %v227_v3  ;;  %177 = vmatprep.mubr.msk.f32.mxu0 %vm228_vm0, %v229_v6 }
   0x2   :  { %v181_v4 = vpack.c.bf16 %v17_v1, %v16_v0  ;;  %v19_v5 = vld [vmem:[%s306_s1 + $0x18] sm:$0xff]  ;;  %v20_v8 = vld [vmem:[%s306_s1 + $0x20] sm:$0xff]  ;;  %v21_v9 = vld [vmem:[%s306_s1 + $0x28] sm:$0xff] }
   0x3   :  { %v184_v7 = vpack.c.bf16 %v19_v5, %v18_v2 }
   0x4   :  { %182 = vmatpush3.bf16.msra.mxu0 %v181_v4 }
   0x5   :  { %183 = vmatprep.subr.bf16.mxu0 %v227_v3 }
   0x6   :  { %8 = vsyncpa [#allocation3], 0  ;;  %v187_v10 = vpack.c.bf16 %v21_v9, %v20_v8  ;;  %v22_v11 = vld [vmem:[%s306_s1 + $0x30] sm:$0xff]  ;;  %v23_v12 = vld [vmem:[%s306_s1 + $0x38] sm:$0xff]  ;;  %vm38_vm1 = vcmask 1043456   ;;  %vm34_vm2 = vcmask 687104  }
   0x7   :  { %v190_v13 = vpack.c.bf16 %v23_v12, %v22_v11  ;;  %v24_v14 = vld [vmem:[%s306_s1 + $0x40] sm:$0xff]  ;;  %v25_v15 = vld [vmem:[%s306_s1 + $0x48] sm:$0xff]  ;;  %v26_v17 = vld [vmem:[%s306_s1 + $0x50] sm:$0xf]  ;;  %vm112_vm3 = vcmask 80896  }
   0x8   :  { %185 = vmatpush3.bf16.msra.mxu0 %v184_v7  ;;  %v193_v16 = vpack.c.bf16 %v25_v15, %v24_v14  ;;  %v15_v18 = vld [vmem:[%s305_s0] sm:$0xff]  ;;  %s230_s0 = smov [#allocation2]  }
   0x9   :  { %186 = vmatprep.subr.bf16.mxu0 %v227_v3  ;;  %v140_v19 = vld [vmem:[%s307_s2] ss:$0 sm:$0xff]  ;;  %s132_s1 = sshll.u32 %s230_s0, 4  ;;  %s133_s1 = int_to_ptr.vmem [resolvable:$true] %s132_s1 }
   0xa   :  { %s203_s2 = scalar_lea.vmem %s133_s1, 128  ;;  %p208_p1 = scmp.lt.s32.totalorder %s133_s1, %s133_s1 }
   0xb   :  { %p204_p0 = scmp.ne.s32.totalorder %s133_s1, %s203_s2  ;;  %p209_p2 = scmp.lt.s32.totalorder %s203_s2, %s203_s2 }
   0xc   :  { %188 = vmatpush3.bf16.msra.mxu0 %v187_v10 }
   0xd   :  { %189 = vmatprep.subr.bf16.mxu0 %v227_v3  ;;  %p210_p3 = por %p209_p2, %p208_p1 }
   0xf   :  { %p211_p4 = pnand %p210_p3, %p204_p0 }
  0x10   :  { %191 = vmatpush3.bf16.msra.mxu0 %v190_v13 }
  0x11   :  { %192 = vmatprep.subr.bf16.mxu0 %v227_v3 }
  0x14   :  { %194 = vmatpush3.bf16.msra.mxu0 %v193_v16 }
  0x15   :  { %175 = vmatprep.subr.mxu0 %v229_v6 }
  0x18   :  { %176 = vmatpush3.msk.msra.mxu0 %vm38_vm1, %v26_v17 }
  0x19   :  { %178 = vmatmul.mubr.msk.f32.vlgmr.msra.gmra.mrb[0].mxu0 %vm34_vm2, %v15_v18 }
  0xec   :  { %v108_v20 = vpop.f32.mrb[0].mxu0 }
  0xed   :  { %v109_v21 = vadd.f32 %v140_v19, %v108_v20  ;;  %v179_v22 = vpop.f32.mrb[1].mxu0 }
  0xef   :  { %v113_v23 = vsel %vm112_vm3, %v109_v21, -inf }
  0xf0   :  { %114 = vmax.xlane.f32.xlu0 %v113_v23 }
 0x17d   :  { %v115_v24 = vpop.xlane.xlu0 %114 }
 0x17e   :  { %v116_v25 = vsub.f32 %v109_v21, %v115_v24 }
 0x180   :  { %v117_v26 = vmul.f32 1.442695, %v116_v25 }
 0x182   :  { %199 = vpow2.f32 %v117_v26 }
 0x18c   :  { %v200_v27 = vpop.eup %199 }
 0x18d   :  { %v119_v28 = vsel %vm112_vm3, %v200_v27, 0.0 }
 0x18e   :  { %120 = vadd.xlane.f32.xlu0 %v119_v28 }
 0x21b   :  { %v121_v29 = vpop.xlane.xlu0 %120 }
 0x21c   :  { %201 = vlog2.f32 %v121_v29 }
 0x226   :  { %v202_v30 = vpop.eup %201 }
 0x227   :  { %v123_v31 = vmul.f32 0.6931472, %v202_v30 }
 0x229   :  { %v124_v32 = vsub.f32 %v116_v25, %v123_v31 }
 0x22b   :  { %125 = vst.msk [vmem:[#allocation2] sm:$0xff] %vm112_vm3, %v124_v32 }
 0x22c   :  { %214 = shalt.err (!%p211_p4)
}
 0x22d   :  { %s215_s13 = scalar_lea.hbm %s308_s3, 128 }
 0x22e   :  { %p216_p5 = scmp.ne.s32.totalorder %s308_s3, %s215_s13  ;;  %p219_p6 = scmp.lt.u32.totalorder %s215_s13, %s308_s3 }
 0x230   :  { %p221_p7 = pnand %p219_p6, %p216_p5 }
 0x232   :  { %224 = shalt.err (!%p221_p7)
}
 0x233   :  { %135 = dma.vmem_to_hbm [thread:$0]  %s133_s1, 128, %s308_s3, [#allocation3]  }
 0x234   :  { %225 = dma.done.wait [#allocation3], 128  }
 0x235   :  { %226 = vsyncadd [#allocation3], 4294967168 }
 0x236   :  { %139 = vsyncpa [#allocation3], 1 }

</bundles_post_ra>
